<compile_context>
chip_gen: v7x
topology: tpu7x:2x2x1
jax: 0.10.0
libtpu: 0.0.40
codegen_flags: <defaults>
</compile_context>

<pallas_src>
import functools

import jax
import jax.numpy as jnp
from jax.experimental import pallas as pl
from jax.experimental.pallas import tpu as pltpu


def _lgc_kernel(x_ref, scale_ref, shift_ref, w_ref, o_ref):
    """Fused BN(eval) + ReLU + 1x1-conv-as-matmul on one (nb, Cin, ts) tile.

    x_ref:     (nb, Cin, ts)  native dtype  activation tile (spatial on lanes)
    scale_ref: (Cin, 1)       f32           folded BN scale (per input channel)
    shift_ref: (Cin, 1)       f32           folded BN shift
    w_ref:     (Cout, Cin)    bf16          masked 1x1-conv weight (resident)
    o_ref:     (nb, Cout, ts) native dtype  output tile (lane-dense)
    """
    w = w_ref[...]                                     # (Cout, Cin) bf16, resident
    scale = scale_ref[...]                             # (Cin, 1) f32
    shift = shift_ref[...]                             # (Cin, 1) f32
    nb = x_ref.shape[0]
    for b in range(nb):                                # static, small; LLO-visible
        x = x_ref[b].astype(jnp.float32)               # (Cin, ts) f32 on the VPU
        h = jnp.maximum(x * scale + shift, 0.0)        # fused BN + ReLU (f32, v5e-safe)
        # MXU: (Cout, Cin) @ (Cin, ts) -> (Cout, ts), bf16 operands, f32 accumulation.
        o_ref[b] = jnp.dot(w, h.astype(jnp.bfloat16),
                           preferred_element_type=jnp.float32).astype(o_ref.dtype)


@functools.lru_cache(maxsize=None)
def _vmem_capacity_bytes():
    try:
        return int(pltpu.get_tpu_info().vmem_capacity_bytes)
    except Exception:
        return 64 * 1024 * 1024      # conservative fallback (v7x per-core VMEM)


def _vmem_estimate_bytes(nb, ts, cin, cout, x_bytes, out_bytes):
    """VMEM footprint for one grid step: double-buffered tiles + kernel temps."""
    x_tile = nb * cin * ts * x_bytes            # activation tile (native dtype)
    o_tile = nb * cout * ts * out_bytes         # output tile (native dtype)
    resident = cin * cout * 2 + 2 * cin * 4     # bf16 W + f32 scale/shift
    temps = nb * cin * ts * (4 + 2)             # f32 BN/ReLU temp + bf16 staging
    return 2 * (x_tile + o_tile + resident) + temps


@functools.partial(jax.jit, static_argnames=("ts_max",))
def learned_group_conv_forward(x, conv_weight, mask, gamma, beta,
                               running_mean, running_var, eps=1e-5, ts_max=2048):
    """x: [N, Cin, H, W] (NCHW, any float dtype).  conv_weight/mask: [Cout, Cin, 1, 1]."""
    N, Cin, H, W = x.shape
    Cout = conv_weight.shape[0]
    HW = H * W
    out_dtype = x.dtype
    x_bytes = jnp.dtype(x.dtype).itemsize
    out_bytes = jnp.dtype(out_dtype).itemsize

    # --- glue (plain JAX, O(C) / O(C^2)) ------------------------------------
    # Fold inference-form BN into per-channel scale/shift (broadcast on lanes).
    inv_std = 1.0 / jnp.sqrt(running_var.astype(jnp.float32) + eps)
    g32 = gamma.astype(jnp.float32)
    bn_scale = (g32 * inv_std).reshape(Cin, 1)
    bn_shift = (beta.astype(jnp.float32)
                - running_mean.astype(jnp.float32) * g32 * inv_std).reshape(Cin, 1)

    # Masked 1x1-conv weight -> [Cout, Cin] bf16 (f32 accumulation in-kernel).
    w_masked = (conv_weight.astype(jnp.float32)
                * mask.astype(jnp.float32)).reshape(Cout, Cin).astype(jnp.bfloat16)

    # --- generation-aware VMEM budget ---------------------------------------
    vmem_cap = _vmem_capacity_bytes()                       # 128 MiB v5e/v6e, 64 MiB v7x
    vmem_budget = int(0.55 * vmem_cap)                      # ~70 MiB / ~35 MiB
    vmem_limit = int(min(0.75 * vmem_cap, vmem_cap - 16 * 1024 * 1024))

    # --- spatial tile: full HW if it fits, else a large multiple of 128 ------
    if HW <= ts_max:
        ts = HW                                             # full-extent block (legal)
    else:
        ts = max(128, (ts_max // 128) * 128)                # ragged last block handled by Pallas

    # --- batch blocking: amortize per-step overhead for small-HW layers ------
    lane_target = 2048
    if ts >= lane_target or N == 1:
        nb = 1
    else:
        nb = min(N, max(1, lane_target // ts))
        while nb > 1 and N % nb != 0:                       # keep the batch grid exact
            nb -= 1

    def _fits(nb_, ts_):
        return _vmem_estimate_bytes(nb_, ts_, Cin, Cout, x_bytes, out_bytes) <= vmem_budget

    while not _fits(nb, ts):
        if nb > 1:
            nb -= 1
            while nb > 1 and N % nb != 0:
                nb -= 1
        elif ts > 128:
            ts = max(128, ((ts - 1) // 128) * 128)
        else:
            break

    # --- NCHW kept as-is: free reshape to [N, Cin, H*W]; NO pad, NO astype ---
    x3 = x.reshape(N, Cin, HW)
    grid = (N // nb, pl.cdiv(HW, ts))

    out3 = pl.pallas_call(
        _lgc_kernel,
        out_shape=jax.ShapeDtypeStruct((N, Cout, HW), out_dtype),
        grid_spec=pltpu.PrefetchScalarGridSpec(
            num_scalar_prefetch=0,
            grid=grid,
            in_specs=[
                pl.BlockSpec((nb, Cin, ts), lambda n, s: (n, 0, s)),   # activation tile
                pl.BlockSpec((Cin, 1), lambda n, s: (0, 0)),           # bn scale (resident)
                pl.BlockSpec((Cin, 1), lambda n, s: (0, 0)),           # bn shift (resident)
                pl.BlockSpec((Cout, Cin), lambda n, s: (0, 0)),        # W        (resident)
            ],
            out_specs=pl.BlockSpec((nb, Cout, ts), lambda n, s: (n, 0, s)),
        ),
        compiler_params=pltpu.CompilerParams(
            dimension_semantics=("parallel", "parallel"),
            vmem_limit_bytes=vmem_limit),
    )(x3, bn_scale, bn_shift, w_masked)

    # Output is already NCHW; final reshape is free.
    return out3.reshape(N, Cout, H, W)


def _reference(x, conv_weight, mask, gamma, beta, running_mean, running_var, eps=1e-5):
    """Pure-JAX (f32) reference of the same forward, for a correctness check."""
    xf = x.astype(jnp.float32)
    inv_std = 1.0 / jnp.sqrt(running_var + eps)
    h = (xf - running_mean[None, :, None, None]) * inv_std[None, :, None, None]
    h = h * gamma[None, :, None, None] + beta[None, :, None, None]
    h = jnp.maximum(h, 0.0)
    w = (conv_weight * mask)[:, :, 0, 0]                      # [Cout, Cin]
    return jnp.einsum("nchw,oc->nohw", h, w)


def _run_case(key, N, Cin, Cout, H, W, ts_max):
    kx, kw = jax.random.split(key)
    x = jax.random.normal(kx, (N, Cin, H, W), dtype=jnp.float32)
    conv_weight = jax.random.normal(kw, (Cout, Cin, 1, 1), dtype=jnp.float32) * 0.1
    mask = jnp.ones((Cout, Cin, 1, 1), dtype=jnp.float32)      # _mask buffer (all ones)
    gamma = jnp.ones((Cin,), dtype=jnp.float32)                # BN weight
    beta = jnp.zeros((Cin,), dtype=jnp.float32)                # BN bias
    running_mean = jnp.zeros((Cin,), dtype=jnp.float32)
    running_var = jnp.ones((Cin,), dtype=jnp.float32)

    out = learned_group_conv_forward(x, conv_weight, mask, gamma, beta,
                                     running_mean, running_var, ts_max=ts_max)
    out = jax.block_until_ready(out)

    ref = _reference(x, conv_weight, mask, gamma, beta, running_mean, running_var)
    assert out.shape == (N, Cout, H, W)
    # bf16 matmul operands with f32 accumulation -> ~1e-2 relative tolerance.
    rel_err = jnp.max(jnp.abs(out.astype(jnp.float32) - ref)) / (jnp.max(jnp.abs(ref)) + 1e-6)
    assert rel_err < 2e-2, f"mismatch vs reference, rel_err={rel_err}"


if __name__ == "__main__":
    # Module hyper-params consistent with the asserts in __init__:
    #   in_channels % groups == 0, in_channels % condense_factor == 0,
    #   out_channels % groups == 0, kernel_size == 1, dropout_rate == 0.
    key = jax.random.PRNGKey(0)
    k1, k2 = jax.random.split(key)

    # Case 1: small-HW layer -> batched block (nb > 1), single spatial tile.
    _run_case(k1, N=2, Cin=8, Cout=16, H=16, W=16, ts_max=2048)

    # Case 2: forced spatial tiling with a ragged last block (HW=400, ts=128).
    _run_case(k2, N=1, Cin=16, Cout=32, H=20, W=20, ts_max=128)

    print("KERNEL_OK")
</pallas_src>

<mosaic_0001>
module attributes {stable_mosaic.version = 11 : i64} {
  func.func @_lgc_kernel(%arg0: i32, %arg1: i32, %arg2: memref<2x8x256xf32, #tpu.memory_space<vmem>>, %arg3: memref<8x1xf32, #tpu.memory_space<vmem>>, %arg4: memref<8x1xf32, #tpu.memory_space<vmem>>, %arg5: memref<16x8xbf16, #tpu.memory_space<vmem>>, %arg6: memref<2x16x256xf32, #tpu.memory_space<vmem>>) attributes {dimension_semantics = [#tpu.dimension_semantics<parallel>, #tpu.dimension_semantics<parallel>], iteration_bounds = array<i64: 1, 1>, scalar_prefetch = 0 : i64, scratch_operands = 0 : i64, tpu.core_type = #tpu.core_type<tc>, window_params = [{transform_indices = @transform_0, window_bounds = array<i64: 2, 8, 256>}, {pipeline_mode = #tpu.pipeline_mode<synchronous>, transform_indices = @transform_1, window_bounds = array<i64: 8, 1>}, {pipeline_mode = #tpu.pipeline_mode<synchronous>, transform_indices = @transform_2, window_bounds = array<i64: 8, 1>}, {pipeline_mode = #tpu.pipeline_mode<synchronous>, transform_indices = @transform_3, window_bounds = array<i64: 16, 8>}, {transform_indices = @transform_4, window_bounds = array<i64: 2, 16, 256>}]} {
    %c0 = arith.constant 0 : index
    %c0_0 = arith.constant 0 : index
    %0 = vector.load %arg5[%c0, %c0_0] : memref<16x8xbf16, #tpu.memory_space<vmem>>, vector<16x8xbf16>
    %c0_1 = arith.constant 0 : index
    %c0_2 = arith.constant 0 : index
    %1 = vector.load %arg3[%c0_1, %c0_2] : memref<8x1xf32, #tpu.memory_space<vmem>>, vector<8x1xf32>
    %c0_3 = arith.constant 0 : index
    %c0_4 = arith.constant 0 : index
    %2 = vector.load %arg4[%c0_3, %c0_4] : memref<8x1xf32, #tpu.memory_space<vmem>>, vector<8x1xf32>
    %c0_5 = arith.constant 0 : index
    %c0_6 = arith.constant 0 : index
    %c0_7 = arith.constant 0 : index
    %3 = vector.load %arg2[%c0_5, %c0_6, %c0_7] : memref<2x8x256xf32, #tpu.memory_space<vmem>>, vector<1x8x256xf32>
    %4 = vector.shape_cast %3 : vector<1x8x256xf32> to vector<8x256xf32>
    %5 = vector.broadcast %1 : vector<8x1xf32> to vector<8x256xf32>
    %6 = arith.mulf %4, %5 : vector<8x256xf32>
    %7 = vector.broadcast %2 : vector<8x1xf32> to vector<8x256xf32>
    %8 = arith.addf %6, %7 : vector<8x256xf32>
    %cst = arith.constant 0.000000e+00 : f32
    %9 = vector.broadcast %cst : f32 to vector<8x256xf32>
    %10 = arith.maximumf %8, %9 : vector<8x256xf32>
    %11 = arith.truncf %10 : vector<8x256xf32> to vector<8x256xbf16>
    %cst_8 = arith.constant dense<0.000000e+00> : vector<16x256xf32>
    %12 = tpu.matmul %0, %11, %cst_8 {dimension_numbers = #tpu.dot_dimension_numbers<[1], [0], [0], [1], [0, 0, 1, 1], [], []>} : vector<16x8xbf16>, vector<8x256xbf16>, vector<16x256xf32> -> vector<16x256xf32>
    %c0_9 = arith.constant 0 : index
    %c0_10 = arith.constant 0 : index
    %c0_11 = arith.constant 0 : index
    %13 = vector.load %arg6[%c0_9, %c0_10, %c0_11] : memref<2x16x256xf32, #tpu.memory_space<vmem>>, vector<1x16x256xf32>
    %14 = vector.shape_cast %13 : vector<1x16x256xf32> to vector<16x256xf32>
    %15 = vector.shape_cast %12 : vector<16x256xf32> to vector<1x16x256xf32>
    tpu.vector_store %arg6[%c0_9, %c0_10, %c0_11], %15 {strides = array<i32>} : memref<2x16x256xf32, #tpu.memory_space<vmem>>, vector<1x16x256xf32>,
    %c1 = arith.constant 1 : index
    %c0_12 = arith.constant 0 : index
    %c0_13 = arith.constant 0 : index
    %16 = vector.load %arg2[%c1, %c0_12, %c0_13] : memref<2x8x256xf32, #tpu.memory_space<vmem>>, vector<1x8x256xf32>
    %17 = vector.shape_cast %16 : vector<1x8x256xf32> to vector<8x256xf32>
    %18 = vector.broadcast %1 : vector<8x1xf32> to vector<8x256xf32>
    %19 = arith.mulf %17, %18 : vector<8x256xf32>
    %20 = vector.broadcast %2 : vector<8x1xf32> to vector<8x256xf32>
    %21 = arith.addf %19, %20 : vector<8x256xf32>
    %cst_14 = arith.constant 0.000000e+00 : f32
    %22 = vector.broadcast %cst_14 : f32 to vector<8x256xf32>
    %23 = arith.maximumf %21, %22 : vector<8x256xf32>
    %24 = arith.truncf %23 : vector<8x256xf32> to vector<8x256xbf16>
    %cst_15 = arith.constant dense<0.000000e+00> : vector<16x256xf32>
    %25 = tpu.matmul %0, %24, %cst_15 {dimension_numbers = #tpu.dot_dimension_numbers<[1], [0], [0], [1], [0, 0, 1, 1], [], []>} : vector<16x8xbf16>, vector<8x256xbf16>, vector<16x256xf32> -> vector<16x256xf32>
    %c1_16 = arith.constant 1 : index
    %c0_17 = arith.constant 0 : index
    %c0_18 = arith.constant 0 : index
    %26 = vector.load %arg6[%c1_16, %c0_17, %c0_18] : memref<2x16x256xf32, #tpu.memory_space<vmem>>, vector<1x16x256xf32>
    %27 = vector.shape_cast %26 : vector<1x16x256xf32> to vector<16x256xf32>
    %28 = vector.shape_cast %25 : vector<16x256xf32> to vector<1x16x256xf32>
    tpu.vector_store %arg6[%c1_16, %c0_17, %c0_18], %28 {strides = array<i32>} : memref<2x16x256xf32, #tpu.memory_space<vmem>>, vector<1x16x256xf32>,
    return
  }
  func.func @transform_0(%arg0: i32, %arg1: i32) -> (i32, i32, i32) {
    %c0_i32 = arith.constant 0 : i32
    %c0_i32_0 = arith.constant 0 : i32
    return %arg0, %c0_i32, %arg1 : i32, i32, i32
  }
  func.func @transform_1(%arg0: i32, %arg1: i32) -> (i32, i32) {
    %c0_i32 = arith.constant 0 : i32
    %c0_i32_0 = arith.constant 0 : i32
    %c0_i32_1 = arith.constant 0 : i32
    return %c0_i32, %c0_i32_0 : i32, i32
  }
  func.func @transform_2(%arg0: i32, %arg1: i32) -> (i32, i32) {
    %c0_i32 = arith.constant 0 : i32
    %c0_i32_0 = arith.constant 0 : i32
    %c0_i32_1 = arith.constant 0 : i32
    return %c0_i32, %c0_i32_0 : i32, i32
  }
  func.func @transform_3(%arg0: i32, %arg1: i32) -> (i32, i32) {
    %c0_i32 = arith.constant 0 : i32
    %c0_i32_0 = arith.constant 0 : i32
    %c0_i32_1 = arith.constant 0 : i32
    return %c0_i32, %c0_i32_0 : i32, i32
  }
  func.func @transform_4(%arg0: i32, %arg1: i32) -> (i32, i32, i32) {
    %c0_i32 = arith.constant 0 : i32
    %c0_i32_0 = arith.constant 0 : i32
    return %arg0, %c0_i32, %arg1 : i32, i32, i32
  }
}

</mosaic_0001>

<bundles_post_ra>
// kernel: learned_group_conv_forward.1
= control target key start
LH: loop header
LB: loop body
LE: loop exit
PB: predicated region body
PF: predicated region fallthrough
CT: control target
= control target key end

     0   :  { %v188_v0 = vmov 0   ;;  %vm51_vm0 = vcmask 1043456   ;;  %vm47_vm1 = vcmask 64512   ;;  %s259_s1 = inlined_call_operand.vmem [shape: f32[8,1], index: 1, kind: input, shape index: {}]   ;;  %s260_s2 = inlined_call_operand.vmem [shape: f32[8,1], index: 2, kind: input, shape index: {}]   ;;  %s261_s3 = inlined_call_operand.vmem [shape: bf16[16,8], index: 3, kind: input, shape index: {}]   ;;  %s262_s0 = inlined_call_operand.vmem [shape: f32[2,8,256], index: 0, kind: input, shape index: {}]   ;;  %s263_s4 = inlined_call_operand.vmem [shape: f32[2,16,256], index: 4, kind: output, shape index: {}]  }
   0x1   :  { %186 = vset.pattern.permute.xlu0 %v188_v0  ;;  %v20_v1 = vld [vmem:[%s259_s1] sm:$0xff]  ;;  %90 = vmatprep.mubr.bf16.mxu0 %v188_v0  ;;  %v23_v3 = vld [vmem:[%s262_s0 + $0x8] sm:$0xff]  ;;  %v178_v5 = vld [vmem:[%s262_s0 + $0x18] sm:$0xff] }
   0x2   :  { %26 = vperm.xlu0 %186, %v20_v1   ;;  %154 = vmatprep.mubr.bf16.mxu1 %v188_v0  ;;  %v21_v2 = vld [vmem:[%s260_s2] sm:$0xff]  ;;  %v177_v7 = vld [vmem:[%s262_s0 + $0x10] sm:$0xff] }
   0x3   :  { %v22_v6 = vld [vmem:[%s262_s0] sm:$0xff] }
   0x4   :  { %v187_v27 = vld [vmem:[%s261_s3] sm:$0xff]  }
   0x6   :  { %33 = vperm.xlu0 %186, %v21_v2  }
  0x81   :  { %v27_v4 = vpop.permute.xlu0 %26 }
  0x82   :  { %v30_v8 = vmul.f32 %v27_v4, %v23_v3  ;;  %v109_v9 = vmul.f32 %v178_v5, %v27_v4  ;;  %v29_v10 = vmul.f32 %v27_v4, %v22_v6  ;;  %v108_v11 = vmul.f32 %v177_v7, %v27_v4 }
  0x85   :  { %v34_v12 = vpop.permute.xlu0 %33 }
  0x86   :  { %v37_v13 = vadd.f32 %v34_v12, %v30_v8  ;;  %v111_v14 = vadd.f32 %v109_v9, %v34_v12  ;;  %v36_v15 = vadd.f32 %v34_v12, %v29_v10  ;;  %v110_v16 = vadd.f32 %v108_v11, %v34_v12 }
  0x88   :  { %v39_v17 = vmax.f32 %v37_v13, 0.0  ;;  %v113_v18 = vmax.f32 %v111_v14, 0.0  ;;  %v38_v19 = vmax.f32 %v36_v15, 0.0  ;;  %v112_v20 = vmax.f32 %v110_v16, 0.0 }
  0x8a   :  { %v41_v21 = vpack.c.bf16 %v39_v17, %v39_v17  ;;  %v115_v22 = vpack.c.bf16 %v113_v18, %v113_v18  ;;  %v40_v23 = vpack.c.bf16 %v38_v19, %v38_v19  ;;  %v114_v24 = vpack.c.bf16 %v112_v20, %v112_v20 }
  0x8c   :  { %175 = vmatprep.subr.msk.bf16.mxu0 %vm51_vm0, %v41_v21  ;;  %179 = vmatprep.subr.msk.bf16.mxu1 %vm51_vm0, %v115_v22  ;;  %v53_v25 = vsel %vm51_vm0, %v40_v23, 0  ;;  %v117_v26 = vsel %vm51_vm0, %v114_v24, 0 }
  0x8d   :  { %59 = vmatpush1.bf16.msra.mxu0 %v53_v25  ;;  %123 = vmatpush1.bf16.msra.mxu1 %v117_v26 }
  0x90   :  { %176 = vmatmul.mubr.msk.bf16.vlgmr.msra.gmra.mrb[0].mxu0 %vm47_vm1, %v187_v27  ;;  %180 = vmatmul.mubr.msk.bf16.vlgmr.msra.gmra.mrb[0].mxu1 %vm47_vm1, %v187_v27 }
 0x163   :  { %v92_v28 = vpop.f32.mrb[0].mxu0  ;;  %v156_v29 = vpop.f32.mrb[0].mxu1 }
 0x164   :  { %101 = vst [vmem:[%s263_s4] sm:$0xff] %v92_v28  ;;  %181 = vst [vmem:[%s263_s4 + $0x20] sm:$0xff] %v156_v29  ;;  %v94_v30 = vpop.f32.mrb[1].mxu0  ;;  %v158_v31 = vpop.f32.mrb[1].mxu1 }
 0x165   :  { %102 = vst [vmem:[%s263_s4 + $0x8] sm:$0xff] %v94_v30  ;;  %182 = vst [vmem:[%s263_s4 + $0x28] sm:$0xff] %v158_v31  ;;  %v96_v32 = vpop.f32.mrb[2].mxu0  ;;  %v160_v33 = vpop.f32.mrb[2].mxu1 }
 0x166   :  { %103 = vst [vmem:[%s263_s4 + $0x10] sm:$0xff] %v96_v32  ;;  %183 = vst [vmem:[%s263_s4 + $0x30] sm:$0xff] %v160_v33  ;;  %v98_v34 = vpop.f32.mrb[3].mxu0  ;;  %v162_v35 = vpop.f32.mrb[3].mxu1 }
 0x167   :  { %104 = vst [vmem:[%s263_s4 + $0x18] sm:$0xff] %v98_v34  ;;  %184 = vst [vmem:[%s263_s4 + $0x38] sm:$0xff] %v162_v35 }

</bundles_post_ra>
